<compile_context>
chip_gen: v7x
topology: tpu7x:2x2x1
jax: 0.10.0
libtpu: 0.0.40
codegen_flags: <defaults>
</compile_context>

<pallas_src>
import functools
import math

import jax
import jax.numpy as jnp
from jax import lax
from jax.experimental import pallas as pl
from jax.experimental.pallas import tpu as pltpu


def _round_up(x, m):
    return -(-x // m) * m


# ---------------------------------------------------------------------------
# Fast path (small vocab): one-hot(ids) @ LUT on the MXU, one dense store/tile.
# ---------------------------------------------------------------------------
def _embed_onehot_kernel(ids_ref, lut_ref, out_ref, *, scale, vocab):
    ids = ids_ref[...]                                    # (tile, 1) int32
    tile = ids.shape[0]
    col = lax.broadcasted_iota(jnp.int32, (tile, vocab), 1)
    lut_vals = lut_ref[...]                               # (vocab, d_model)
    onehot = (ids == col).astype(lut_vals.dtype)          # (tile, vocab)
    emb = jnp.dot(onehot, lut_vals, preferred_element_type=jnp.float32)
    out_ref[...] = (emb * scale).astype(out_ref.dtype)    # full-tile scale


# ---------------------------------------------------------------------------
# Large-vocab path: LUT stays in HBM; per token tile issue n_inflight row DMAs
# into a VMEM scratch (pipelined), then one dense scaled store.
# ---------------------------------------------------------------------------
def _embed_dma_gather_kernel(ids_sm, lut_hbm, out_ref, rows, sems, *,
                             scale, tile, n_inflight):
    base = pl.program_id(0) * tile

    def start_row(t):
        tok = ids_sm[base + t]
        pltpu.make_async_copy(
            lut_hbm.at[pl.ds(tok, 1), :],
            rows.at[pl.ds(t, 1), :],
            sems.at[t % n_inflight],
        ).start()

    def wait_row(t):
        # Same transfer size as start_row; source row index is irrelevant for wait.
        pltpu.make_async_copy(
            lut_hbm.at[pl.ds(0, 1), :],
            rows.at[pl.ds(t, 1), :],
            sems.at[t % n_inflight],
        ).wait()

    # Prime n_inflight row copies.
    for t in range(n_inflight):
        start_row(t)

    def body(t, carry):
        wait_row(t)

        @pl.when(t + n_inflight < tile)
        def _():
            start_row(t + n_inflight)

        return carry

    lax.fori_loop(0, tile, body, 0)
    out_ref[...] = (rows[...] * scale).astype(out_ref.dtype)


def embeddings_fwd(ids, lut, *, max_tile=512, one_hot_max_vocab=2048,
                   n_inflight=8):
    """ids: (B, S) int token ids; lut: (vocab, d_model) float table."""
    B, S = ids.shape
    vocab, d_model = lut.shape
    N = B * S
    scale = float(math.sqrt(d_model))
    itemsize = jnp.dtype(lut.dtype).itemsize

    # Clamp ids: TPU gathers / DMAs have no runtime bounds check.
    flat_ids = jnp.clip(ids.reshape(N).astype(jnp.int32), 0, vocab - 1)

    # Token tile: either the whole (8-padded) problem, or 512 (multiple of 128).
    if N <= max_tile:
        tile = _round_up(N, 8)
    else:
        tile = max_tile
    n_pad = _round_up(N, tile)
    n_tiles = n_pad // tile

    # Generation-aware VMEM capacity (v5e/v6e: 128 MiB, v7x: 64 MiB per TC).
    try:
        vmem_cap = int(pltpu.get_tpu_info().vmem_capacity_bytes)
    except Exception:
        vmem_cap = 64 * 1024 * 1024

    lut_bytes = vocab * d_model * itemsize

    # ------------------------------------------------------------------
    # Fast path: small vocab -> one-hot @ LUT on the MXU.
    # ------------------------------------------------------------------
    onehot_working = (
        2 * lut_bytes                      # LUT block (pipeline-buffered, small)
        + 2 * tile * d_model * itemsize    # output tile (double-buffered)
        + 2 * tile * 4                     # id tiles
        + tile * vocab * 4                 # in-kernel one-hot intermediate
        + (1 << 20))                       # slack
    if vocab <= one_hot_max_vocab and onehot_working <= int(0.6 * vmem_cap):
        ids_pad = jnp.zeros((n_pad, 1), jnp.int32).at[:N, 0].set(flat_ids)
        vmem_limit = int(min(int(0.9 * vmem_cap), onehot_working + (8 << 20)))
        cost = pl.CostEstimate(
            flops=2 * n_pad * vocab * d_model + n_pad * d_model,
            transcendentals=0,
            bytes_accessed=lut_bytes + n_pad * d_model * itemsize + n_pad * 4)
        out_flat = pl.pallas_call(
            functools.partial(_embed_onehot_kernel, scale=scale, vocab=vocab),
            out_shape=jax.ShapeDtypeStruct((n_pad, d_model), lut.dtype),
            grid=(n_tiles,),
            in_specs=[
                pl.BlockSpec((tile, 1), lambda i: (i, 0)),
                # Full table, constant block index -> fetched once, kept in VMEM.
                pl.BlockSpec((vocab, d_model), lambda i: (0, 0)),
            ],
            out_specs=pl.BlockSpec((tile, d_model), lambda i: (i, 0)),
            compiler_params=pltpu.CompilerParams(
                dimension_semantics=("parallel",),
                vmem_limit_bytes=vmem_limit),
            cost_estimate=cost,
        )(ids_pad, lut)
        return out_flat[:N].reshape(B, S, d_model)

    # ------------------------------------------------------------------
    # Large vocab: tiled manual DMA row gather; LUT never leaves HBM.
    # ------------------------------------------------------------------
    n_inflight = int(min(n_inflight, tile))
    ids_pad = jnp.zeros((n_pad,), jnp.int32).at[:N].set(flat_ids)
    # TODO(synk): for very long sequences (B*S >> 1e5) chunk the id vector over
    # several pallas_calls to respect SMEM capacity for the scalar prefetch.
    gather_working = (
        tile * d_model * itemsize          # row-gather scratch
        + 2 * tile * d_model * itemsize    # output tile (double-buffered)
        + (1 << 20))
    vmem_limit = int(min(int(0.9 * vmem_cap), gather_working + (8 << 20)))
    cost = pl.CostEstimate(
        flops=n_pad * d_model,
        transcendentals=0,
        bytes_accessed=2 * n_pad * d_model * itemsize + n_pad * 4)
    out_flat = pl.pallas_call(
        functools.partial(_embed_dma_gather_kernel, scale=scale, tile=tile,
                          n_inflight=n_inflight),
        out_shape=jax.ShapeDtypeStruct((n_pad, d_model), lut.dtype),
        grid_spec=pltpu.PrefetchScalarGridSpec(
            num_scalar_prefetch=1,
            grid=(n_tiles,),
            in_specs=[pl.BlockSpec(memory_space=pl.ANY)],
            out_specs=pl.BlockSpec((tile, d_model), lambda i, ids_sm: (i, 0)),
            scratch_shapes=[
                pltpu.VMEM((tile, d_model), lut.dtype),
                pltpu.SemaphoreType.DMA((n_inflight,)),
            ]),
        compiler_params=pltpu.CompilerParams(
            dimension_semantics=("parallel",),
            vmem_limit_bytes=vmem_limit),
        cost_estimate=cost,
    )(ids_pad, lut)
    return out_flat[:N].reshape(B, S, d_model)


if __name__ == "__main__":
    # Small, deterministic shapes consistent with TransformerModel defaults:
    # d_model=256 (lane-dense), small vocab, batch=2, seq=8.
    B, S = 2, 8
    vocab, d_model = 512, 256

    key = jax.random.PRNGKey(0)
    k_ids, k_lut = jax.random.split(key)

    lut = jax.random.normal(k_lut, (vocab, d_model), dtype=jnp.float32)
    ids = jax.random.randint(k_ids, (B, S), 0, vocab, dtype=jnp.int32)

    out = embeddings_fwd(ids, lut)
    out = jax.block_until_ready(out)

    # Pure-JAX reference check.
    ref = jnp.take(lut, ids, axis=0) * math.sqrt(d_model)
    assert out.shape == (B, S, d_model)
    assert jnp.allclose(out, ref, atol=1e-4, rtol=1e-5), float(
        jnp.max(jnp.abs(out - ref)))

    print("KERNEL_OK")
</pallas_src>

<mosaic_0001>
module attributes {stable_mosaic.version = 11 : i64} {
  func.func @_embed_onehot_kernel(%arg0: i32, %arg1: memref<16x1xi32, #tpu.memory_space<vmem>>, %arg2: memref<512x256xf32, #tpu.memory_space<vmem>>, %arg3: memref<16x256xf32, #tpu.memory_space<vmem>>) attributes {dimension_semantics = [#tpu.dimension_semantics<parallel>], iteration_bounds = array<i64: 1>, scalar_prefetch = 0 : i64, scratch_operands = 0 : i64, tpu.core_type = #tpu.core_type<tc>, window_params = [{transform_indices = @transform_0, window_bounds = array<i64: 16, 1>}, {pipeline_mode = #tpu.pipeline_mode<synchronous>, transform_indices = @transform_1, window_bounds = array<i64: 512, 256>}, {transform_indices = @transform_2, window_bounds = array<i64: 16, 256>}]} {
    %c0 = arith.constant 0 : index
    %c0_0 = arith.constant 0 : index
    %0 = vector.load %arg1[%c0, %c0_0] : memref<16x1xi32, #tpu.memory_space<vmem>>, vector<16x1xi32>
    %1 = tpu.iota {dimensions = array<i32: 1>} : vector<16x512xi32>
    %c0_1 = arith.constant 0 : index
    %c0_2 = arith.constant 0 : index
    %2 = vector.load %arg2[%c0_1, %c0_2] : memref<512x256xf32, #tpu.memory_space<vmem>>, vector<512x256xf32>
    %3 = vector.broadcast %0 : vector<16x1xi32> to vector<16x512xi32>
    %4 = arith.cmpi eq, %3, %1 : vector<16x512xi32>
    %5 = arith.extui %4 : vector<16x512xi1> to vector<16x512xi32>
    %6 = arith.sitofp %5 : vector<16x512xi32> to vector<16x512xf32>
    %cst = arith.constant dense<0.000000e+00> : vector<16x256xf32>
    %7 = tpu.matmul %6, %2, %cst {dimension_numbers = #tpu.dot_dimension_numbers<[1], [0], [0], [1], [0, 0, 1, 1], [], []>} : vector<16x512xf32>, vector<512x256xf32>, vector<16x256xf32> -> vector<16x256xf32>
    %cst_3 = arith.constant 1.600000e+01 : f32
    %8 = vector.broadcast %cst_3 : f32 to vector<16x256xf32>
    %9 = arith.mulf %7, %8 : vector<16x256xf32>
    %c0_4 = arith.constant 0 : index
    %c0_5 = arith.constant 0 : index
    %10 = vector.load %arg3[%c0_4, %c0_5] : memref<16x256xf32, #tpu.memory_space<vmem>>, vector<16x256xf32>
    tpu.vector_store %arg3[%c0_4, %c0_5], %9 {strides = array<i32>} : memref<16x256xf32, #tpu.memory_space<vmem>>, vector<16x256xf32>,
    return
  }
  func.func @transform_0(%arg0: i32) -> (i32, i32) {
    %c0_i32 = arith.constant 0 : i32
    %c0_i32_0 = arith.constant 0 : i32
    return %arg0, %c0_i32 : i32, i32
  }
  func.func @transform_1(%arg0: i32) -> (i32, i32) {
    %c0_i32 = arith.constant 0 : i32
    %c0_i32_0 = arith.constant 0 : i32
    %c0_i32_1 = arith.constant 0 : i32
    return %c0_i32, %c0_i32_0 : i32, i32
  }
  func.func @transform_2(%arg0: i32) -> (i32, i32) {
    %c0_i32 = arith.constant 0 : i32
    %c0_i32_0 = arith.constant 0 : i32
    return %arg0, %c0_i32 : i32, i32
  }
}

</mosaic_0001>

<bundles_post_ra>
// kernel: tpu_custom_call.1
= control target key start
LH: loop header
LB: loop body
LE: loop exit
PB: predicated region body
PF: predicated region fallthrough
CT: control target
= control target key end

     0   :  { %7 = vsyncpa [#allocation3], 0  ;;  %s630_s0 = inlined_call_operand.vmem [shape: s32[16,1], index: 0, kind: input, shape index: {}]   ;;  %s631_s1 = inlined_call_operand.hbm [shape: f32[512,256], index: 1, kind: input, shape index: {}]   ;;  %s632_s2 = inlined_call_operand.hbm [shape: f32[16,256], index: 2, kind: output, shape index: {}]  }
   0x1   :  { %8 = vsyncpa [#allocation4], 0  ;;  %s573_s9 = smov [#allocation2]   ;;  %s525_s13 = scalar_lea.hbm %s631_s1, 16384 }
   0x2   :  { %s16_s10 = sshll.u32 %s573_s9, 4  ;;  %p526_p0 = scmp.ne.s32.totalorder %s631_s1, %s525_s13  ;;  %s17_s10 = int_to_ptr.vmem [resolvable:$true] %s16_s10 }
   0x3   :  { %p529_p1 = scmp.lt.u32.totalorder %s525_s13, %s631_s1 }
   0x5   :  { %p531_p2 = pnand %p529_p1, %p526_p0 }
   0x7   :  { %534 = shalt.err (!%p531_p2)
}
   0x8   :  { %s535_s18 = scalar_lea.vmem %s17_s10, 16384  ;;  %p540_p4 = scmp.lt.s32.totalorder %s17_s10, %s17_s10 }
   0x9   :  { %p536_p3 = scmp.ne.s32.totalorder %s17_s10, %s535_s18  ;;  %p541_p5 = scmp.lt.s32.totalorder %s535_s18, %s535_s18 }
   0xb   :  { %p542_p6 = por %p541_p5, %p540_p4 }
   0xd   :  { %p543_p7 = pnand %p542_p6, %p536_p3 }
   0xf   :  { %546 = shalt.err (!%p543_p7)
}
  0x10   :  { %s574_s19 = smov 256   ;;  %s575_s20 = smov 16  }
  0x11   :  { %22 = dma.hbm_to_vmem [thread:$0]  %s631_s1, 16384, %s17_s10, [#allocation3], %s574_s19, %s574_s19, %s575_s20  }
  0x12   :  { %569 = dma.done.wait [#allocation3], 16384  }
  0x13   :  { %570 = vsyncadd [#allocation3], 4294950912  ;;  %v576_v0 = vmov 0   ;;  %v26_v1 = vld [vmem:[%s630_s0] sm:$0xff]  ;;  %v27_v2 = vld [vmem:[%s630_s0 + $0x8] sm:$0xff]  ;;  %s578_s0 = smov [#allocation5]  }
  0x14   :  { %524 = vset.pattern.permute.xlu0 %v576_v0  ;;  %v34_v3 = vld [vmem:[#allocation2 + $0x8] sm:$0xff]  ;;  %v36_v4 = vld [vmem:[#allocation2 + $0x18] sm:$0xff]  ;;  %v33_v9 = vld [vmem:[#allocation2] sm:$0xff]  ;;  %s358_s1 = sshll.u32 %s578_s0, 4  ;;  %s359_s1 = int_to_ptr.vmem [resolvable:$true] %s358_s1 }
  0x15   :  { %162 = vperm.xlu0 %524, %v26_v1   ;;  %v98_v5 = vld [vmem:[#allocation2 + $0x208] sm:$0xff]  ;;  %v100_v6 = vld [vmem:[#allocation2 + $0x218] sm:$0xff]  ;;  %v386_v7 = vpack.c.bf16 %v36_v4, %v34_v3  ;;  %v35_v10 = vld [vmem:[#allocation2 + $0x10] sm:$0xff]  ;;  %s547_s27 = scalar_lea.vmem %s359_s1, 512  ;;  %p552_p9 = scmp.lt.s32.totalorder %s359_s1, %s359_s1 }
  0x16   :  { %v450_v8 = vpack.c.bf16 %v100_v6, %v98_v5  ;;  %v97_v11 = vld [vmem:[#allocation2 + $0x200] sm:$0xff]  ;;  %v388_v12 = vpack.c.bf16 %v35_v10, %v33_v9  ;;  %v99_v13 = vld [vmem:[#allocation2 + $0x210] sm:$0xff]  ;;  %v38_v14 = vld [vmem:[#allocation2 + $0x28] sm:$0xff]  ;;  %p548_p8 = scmp.ne.s32.totalorder %s359_s1, %s547_s27  ;;  %p553_p10 = scmp.lt.s32.totalorder %s547_s27, %s547_s27 }
  0x17   :  { %v40_v15 = vld [vmem:[#allocation2 + $0x38] sm:$0xff]  ;;  %387 = vmatprep.subr.bf16.mxu1 %v386_v7  ;;  %v452_v16 = vpack.c.bf16 %v99_v13, %v97_v11  ;;  %v102_v18 = vld [vmem:[#allocation2 + $0x228] sm:$0xff]  ;;  %v37_v20 = vld [vmem:[#allocation2 + $0x20] sm:$0xff] }
  0x18   :  { %451 = vmatprep.subr.bf16.mxu0 %v450_v8  ;;  %v390_v17 = vpack.c.bf16 %v40_v15, %v38_v14  ;;  %v104_v19 = vld [vmem:[#allocation2 + $0x238] sm:$0xff]  ;;  %389 = vmatpush1.bf16.msra.mxu1 %v388_v12  ;;  %v39_v22 = vld [vmem:[#allocation2 + $0x30] sm:$0xff]  ;;  %v101_v23 = vld [vmem:[#allocation2 + $0x220] sm:$0xff]  ;;  %p554_p11 = por %p553_p10, %p552_p9 }
  0x19   :  { %165 = vperm.xlu0 %524, %v27_v2   ;;  %v454_v21 = vpack.c.bf16 %v104_v19, %v102_v18  ;;  %v103_v24 = vld [vmem:[#allocation2 + $0x230] sm:$0xff]  ;;  %453 = vmatpush1.bf16.msra.mxu0 %v452_v16  ;;  %v392_v25 = vpack.c.bf16 %v39_v22, %v37_v20  ;;  %v42_v27 = vld [vmem:[#allocation2 + $0x48] sm:$0xff]  ;;  %v44_v28 = vld [vmem:[#allocation2 + $0x58] sm:$0xff] }
  0x1a   :  { %391 = vmatprep.subr.bf16.mxu1 %v390_v17  ;;  %v456_v26 = vpack.c.bf16 %v103_v24, %v101_v23  ;;  %v106_v29 = vld [vmem:[#allocation2 + $0x248] sm:$0xff]  ;;  %v394_v30 = vpack.c.bf16 %v44_v28, %v42_v27  ;;  %v108_v31 = vld [vmem:[#allocation2 + $0x258] sm:$0xff]  ;;  %v41_v32 = vld [vmem:[#allocation2 + $0x40] sm:$0xff]  ;;  %p555_p12 = pnand %p554_p11, %p548_p8 }
  0x1b   :  { %455 = vmatprep.subr.bf16.mxu0 %v454_v21  ;;  %v43_v33 = vld [vmem:[#allocation2 + $0x50] sm:$0xff]  ;;  %v458_v34 = vpack.c.bf16 %v108_v31, %v106_v29  ;;  %v105_v35 = vld [vmem:[#allocation2 + $0x240] sm:$0xff]  ;;  %v46_v37 = vld [vmem:[#allocation2 + $0x68] sm:$0xff] }
  0x1c   :  { %v107_v36 = vld [vmem:[#allocation2 + $0x250] sm:$0xff]  ;;  %393 = vmatpush1.bf16.msra.mxu1 %v392_v25  ;;  %v396_v38 = vpack.c.bf16 %v43_v33, %v41_v32  ;;  %v48_v39 = vld [vmem:[#allocation2 + $0x78] sm:$0xff]  ;;  %v110_v40 = vld [vmem:[#allocation2 + $0x268] sm:$0xff] }
  0x1d   :  { %v112_v41 = vld [vmem:[#allocation2 + $0x278] sm:$0xff]  ;;  %457 = vmatpush1.bf16.msra.mxu0 %v456_v26  ;;  %395 = vmatprep.subr.bf16.mxu1 %v394_v30  ;;  %v460_v42 = vpack.c.bf16 %v107_v36, %v105_v35  ;;  %v398_v43 = vpack.c.bf16 %v48_v39, %v46_v37  ;;  %v45_v44 = vld [vmem:[#allocation2 + $0x60] sm:$0xff]  ;;  %v47_v45 = vld [vmem:[#allocation2 + $0x70] sm:$0xff] }
  0x1e   :  { %v109_v46 = vld [vmem:[#allocation2 + $0x260] sm:$0xff]  ;;  %459 = vmatprep.subr.bf16.mxu0 %v458_v34  ;;  %v462_v47 = vpack.c.bf16 %v112_v41, %v110_v40  ;;  %v111_v48 = vld [vmem:[#allocation2 + $0x270] sm:$0xff]  ;;  %v50_v49 = vld [vmem:[#allocation2 + $0x88] sm:$0xff]  ;;  %v400_v53 = vpack.c.bf16 %v47_v45, %v45_v44 }
  0x1f   :  { %v52_v50 = vld [vmem:[#allocation2 + $0x98] sm:$0xff]  ;;  %v114_v51 = vld [vmem:[#allocation2 + $0x288] sm:$0xff]  ;;  %v464_v54 = vpack.c.bf16 %v111_v48, %v109_v46  ;;  %v49_v56 = vld [vmem:[#allocation2 + $0x80] sm:$0xff] }
  0x20   :  { %v116_v52 = vld [vmem:[#allocation2 + $0x298] sm:$0xff]  ;;  %397 = vmatpush1.bf16.msra.mxu1 %v396_v38  ;;  %v402_v55 = vpack.c.bf16 %v52_v50, %v50_v49  ;;  %v51_v57 = vld [vmem:[#allocation2 + $0x90] sm:$0xff]  ;;  %v113_v58 = vld [vmem:[#allocation2 + $0x280] sm:$0xff] }
  0x21   :  { %461 = vmatpush1.bf16.msra.mxu0 %v460_v42  ;;  %399 = vmatprep.subr.bf16.mxu1 %v398_v43  ;;  %v466_v59 = vpack.c.bf16 %v116_v52, %v114_v51  ;;  %v115_v60 = vld [vmem:[#allocation2 + $0x290] sm:$0xff]  ;;  %v54_v61 = vld [vmem:[#allocation2 + $0xa8] sm:$0xff]  ;;  %v56_v62 = vld [vmem:[#allocation2 + $0xb8] sm:$0xff]  ;;  %v404_v1 = vpack.c.bf16 %v51_v57, %v49_v56 }
  0x22   :  { %463 = vmatprep.subr.bf16.mxu0 %v462_v47  ;;  %v118_v63 = vld [vmem:[#allocation2 + $0x2a8] sm:$0xff]  ;;  %v120_v0 = vld [vmem:[#allocation2 + $0x2b8] sm:$0xff]  ;;  %v468_v2 = vpack.c.bf16 %v115_v60, %v113_v58  ;;  %v406_v3 = vpack.c.bf16 %v56_v62, %v54_v61  ;;  %v53_v4 = vld [vmem:[#allocation2 + $0xa0] sm:$0xff] }
  0x23   :  { %v55_v5 = vld [vmem:[#allocation2 + $0xb0] sm:$0xff]  ;;  %v117_v6 = vld [vmem:[#allocation2 + $0x2a0] sm:$0xff]  ;;  %v470_v7 = vpack.c.bf16 %v120_v0, %v118_v63  ;;  %v58_v9 = vld [vmem:[#allocation2 + $0xc8] sm:$0xff] }
  0x24   :  { %401 = vmatpush1.bf16.msra.mxu1 %v400_v53  ;;  %v119_v8 = vld [vmem:[#allocation2 + $0x2b0] sm:$0xff]  ;;  %v60_v10 = vld [vmem:[#allocation2 + $0xd8] sm:$0xff]  ;;  %v122_v11 = vld [vmem:[#allocation2 + $0x2c8] sm:$0xff]  ;;  %v408_v13 = vpack.c.bf16 %v55_v5, %v53_v4 }
  0x25   :  { %465 = vmatpush1.bf16.msra.mxu0 %v464_v54  ;;  %403 = vmatprep.subr.bf16.mxu1 %v402_v55  ;;  %v124_v12 = vld [vmem:[#allocation2 + $0x2d8] sm:$0xff]  ;;  %v472_v14 = vpack.c.bf16 %v119_v8, %v117_v6  ;;  %v410_v15 = vpack.c.bf16 %v60_v10, %v58_v9  ;;  %v57_v16 = vld [vmem:[#allocation2 + $0xc0] sm:$0xff]  ;;  %v59_v17 = vld [vmem:[#allocation2 + $0xd0] sm:$0xff] }
  0x26   :  { %467 = vmatprep.subr.bf16.mxu0 %v466_v59  ;;  %v121_v18 = vld [vmem:[#allocation2 + $0x2c0] sm:$0xff]  ;;  %v474_v19 = vpack.c.bf16 %v124_v12, %v122_v11  ;;  %v123_v20 = vld [vmem:[#allocation2 + $0x2d0] sm:$0xff]  ;;  %v62_v21 = vld [vmem:[#allocation2 + $0xe8] sm:$0xff]  ;;  %v412_v25 = vpack.c.bf16 %v59_v17, %v57_v16 }
  0x27   :  { %v64_v22 = vld [vmem:[#allocation2 + $0xf8] sm:$0xff]  ;;  %v126_v23 = vld [vmem:[#allocation2 + $0x2e8] sm:$0xff]  ;;  %v476_v26 = vpack.c.bf16 %v123_v20, %v121_v18  ;;  %v61_v28 = vld [vmem:[#allocation2 + $0xe0] sm:$0xff] }
  0x28   :  { %405 = vmatpush1.bf16.msra.mxu1 %v404_v1  ;;  %v128_v24 = vld [vmem:[#allocation2 + $0x2f8] sm:$0xff]  ;;  %v414_v27 = vpack.c.bf16 %v64_v22, %v62_v21  ;;  %v63_v29 = vld [vmem:[#allocation2 + $0xf0] sm:$0xff]  ;;  %v125_v30 = vld [vmem:[#allocation2 + $0x2e0] sm:$0xff] }
  0x29   :  { %469 = vmatpush1.bf16.msra.mxu0 %v468_v2  ;;  %407 = vmatprep.subr.bf16.mxu1 %v406_v3  ;;  %v478_v31 = vpack.c.bf16 %v128_v24, %v126_v23  ;;  %v127_v32 = vld [vmem:[#allocation2 + $0x2f0] sm:$0xff]  ;;  %v66_v33 = vld [vmem:[#allocation2 + $0x108] sm:$0xff]  ;;  %v68_v34 = vld [vmem:[#allocation2 + $0x118] sm:$0xff]  ;;  %v416_v37 = vpack.c.bf16 %v63_v29, %v61_v28 }
  0x2a   :  { %471 = vmatprep.subr.bf16.mxu0 %v470_v7  ;;  %v130_v35 = vld [vmem:[#allocation2 + $0x308] sm:$0xff]  ;;  %v132_v36 = vld [vmem:[#allocation2 + $0x318] sm:$0xff]  ;;  %v480_v38 = vpack.c.bf16 %v127_v32, %v125_v30  ;;  %v418_v39 = vpack.c.bf16 %v68_v34, %v66_v33  ;;  %v65_v40 = vld [vmem:[#allocation2 + $0x100] sm:$0xff] }
  0x2b   :  { %v67_v41 = vld [vmem:[#allocation2 + $0x110] sm:$0xff]  ;;  %v129_v42 = vld [vmem:[#allocation2 + $0x300] sm:$0xff]  ;;  %v482_v43 = vpack.c.bf16 %v132_v36, %v130_v35  ;;  %v70_v45 = vld [vmem:[#allocation2 + $0x128] sm:$0xff] }
  0x2c   :  { %409 = vmatpush1.bf16.msra.mxu1 %v408_v13  ;;  %v131_v44 = vld [vmem:[#allocation2 + $0x310] sm:$0xff]  ;;  %v72_v46 = vld [vmem:[#allocation2 + $0x138] sm:$0xff]  ;;  %v134_v47 = vld [vmem:[#allocation2 + $0x328] sm:$0xff]  ;;  %v420_v49 = vpack.c.bf16 %v67_v41, %v65_v40 }
  0x2d   :  { %473 = vmatpush1.bf16.msra.mxu0 %v472_v14  ;;  %411 = vmatprep.subr.bf16.mxu1 %v410_v15  ;;  %v136_v48 = vld [vmem:[#allocation2 + $0x338] sm:$0xff]  ;;  %v484_v50 = vpack.c.bf16 %v131_v44, %v129_v42  ;;  %v422_v51 = vpack.c.bf16 %v72_v46, %v70_v45  ;;  %v69_v52 = vld [vmem:[#allocation2 + $0x120] sm:$0xff]  ;;  %v71_v53 = vld [vmem:[#allocation2 + $0x130] sm:$0xff] }
  0x2e   :  { %475 = vmatprep.subr.bf16.mxu0 %v474_v19  ;;  %v133_v54 = vld [vmem:[#allocation2 + $0x320] sm:$0xff]  ;;  %v486_v55 = vpack.c.bf16 %v136_v48, %v134_v47  ;;  %v135_v56 = vld [vmem:[#allocation2 + $0x330] sm:$0xff]  ;;  %v74_v57 = vld [vmem:[#allocation2 + $0x148] sm:$0xff]  ;;  %v424_v61 = vpack.c.bf16 %v71_v53, %v69_v52 }
  0x2f   :  { %v76_v58 = vld [vmem:[#allocation2 + $0x158] sm:$0xff]  ;;  %v138_v59 = vld [vmem:[#allocation2 + $0x348] sm:$0xff]  ;;  %v488_v62 = vpack.c.bf16 %v135_v56, %v133_v54  ;;  %v73_v0 = vld [vmem:[#allocation2 + $0x140] sm:$0xff] }
  0x30   :  { %413 = vmatpush1.bf16.msra.mxu1 %v412_v25  ;;  %v140_v60 = vld [vmem:[#allocation2 + $0x358] sm:$0xff]  ;;  %v426_v63 = vpack.c.bf16 %v76_v58, %v74_v57  ;;  %v75_v1 = vld [vmem:[#allocation2 + $0x150] sm:$0xff]  ;;  %v137_v2 = vld [vmem:[#allocation2 + $0x340] sm:$0xff] }
  0x31   :  { %477 = vmatpush1.bf16.msra.mxu0 %v476_v26  ;;  %415 = vmatprep.subr.bf16.mxu1 %v414_v27  ;;  %v490_v3 = vpack.c.bf16 %v140_v60, %v138_v59  ;;  %v139_v4 = vld [vmem:[#allocation2 + $0x350] sm:$0xff]  ;;  %v78_v5 = vld [vmem:[#allocation2 + $0x168] sm:$0xff]  ;;  %v80_v6 = vld [vmem:[#allocation2 + $0x178] sm:$0xff]  ;;  %v428_v9 = vpack.c.bf16 %v75_v1, %v73_v0 }
  0x32   :  { %479 = vmatprep.subr.bf16.mxu0 %v478_v31  ;;  %v142_v7 = vld [vmem:[#allocation2 + $0x368] sm:$0xff]  ;;  %v144_v8 = vld [vmem:[#allocation2 + $0x378] sm:$0xff]  ;;  %v492_v10 = vpack.c.bf16 %v139_v4, %v137_v2  ;;  %v430_v11 = vpack.c.bf16 %v80_v6, %v78_v5  ;;  %v77_v12 = vld [vmem:[#allocation2 + $0x160] sm:$0xff] }
  0x33   :  { %v79_v13 = vld [vmem:[#allocation2 + $0x170] sm:$0xff]  ;;  %v141_v14 = vld [vmem:[#allocation2 + $0x360] sm:$0xff]  ;;  %v494_v15 = vpack.c.bf16 %v144_v8, %v142_v7  ;;  %v82_v17 = vld [vmem:[#allocation2 + $0x188] sm:$0xff] }
  0x34   :  { %417 = vmatpush1.bf16.msra.mxu1 %v416_v37  ;;  %v143_v16 = vld [vmem:[#allocation2 + $0x370] sm:$0xff]  ;;  %v84_v18 = vld [vmem:[#allocation2 + $0x198] sm:$0xff]  ;;  %v146_v19 = vld [vmem:[#allocation2 + $0x388] sm:$0xff]  ;;  %v432_v21 = vpack.c.bf16 %v79_v13, %v77_v12 }
  0x35   :  { %481 = vmatpush1.bf16.msra.mxu0 %v480_v38  ;;  %419 = vmatprep.subr.bf16.mxu1 %v418_v39  ;;  %v148_v20 = vld [vmem:[#allocation2 + $0x398] sm:$0xff]  ;;  %v496_v22 = vpack.c.bf16 %v143_v16, %v141_v14  ;;  %v434_v23 = vpack.c.bf16 %v84_v18, %v82_v17  ;;  %v81_v24 = vld [vmem:[#allocation2 + $0x180] sm:$0xff]  ;;  %v83_v25 = vld [vmem:[#allocation2 + $0x190] sm:$0xff] }
  0x36   :  { %483 = vmatprep.subr.bf16.mxu0 %v482_v43  ;;  %v145_v26 = vld [vmem:[#allocation2 + $0x380] sm:$0xff]  ;;  %v498_v27 = vpack.c.bf16 %v148_v20, %v146_v19  ;;  %v147_v28 = vld [vmem:[#allocation2 + $0x390] sm:$0xff]  ;;  %v86_v29 = vld [vmem:[#allocation2 + $0x1a8] sm:$0xff]  ;;  %v436_v33 = vpack.c.bf16 %v83_v25, %v81_v24 }
  0x37   :  { %v88_v30 = vld [vmem:[#allocation2 + $0x1b8] sm:$0xff]  ;;  %v150_v31 = vld [vmem:[#allocation2 + $0x3a8] sm:$0xff]  ;;  %v500_v34 = vpack.c.bf16 %v147_v28, %v145_v26  ;;  %v85_v36 = vld [vmem:[#allocation2 + $0x1a0] sm:$0xff] }
  0x38   :  { %421 = vmatpush1.bf16.msra.mxu1 %v420_v49  ;;  %v152_v32 = vld [vmem:[#allocation2 + $0x3b8] sm:$0xff]  ;;  %v438_v35 = vpack.c.bf16 %v88_v30, %v86_v29  ;;  %v87_v37 = vld [vmem:[#allocation2 + $0x1b0] sm:$0xff]  ;;  %v149_v38 = vld [vmem:[#allocation2 + $0x3a0] sm:$0xff] }
  0x39   :  { %485 = vmatpush1.bf16.msra.mxu0 %v484_v50  ;;  %423 = vmatprep.subr.bf16.mxu1 %v422_v51  ;;  %v502_v39 = vpack.c.bf16 %v152_v32, %v150_v31  ;;  %v151_v40 = vld [vmem:[#allocation2 + $0x3b0] sm:$0xff]  ;;  %v90_v41 = vld [vmem:[#allocation2 + $0x1c8] sm:$0xff]  ;;  %v92_v42 = vld [vmem:[#allocation2 + $0x1d8] sm:$0xff]  ;;  %v440_v45 = vpack.c.bf16 %v87_v37, %v85_v36 }
  0x3a   :  { %487 = vmatprep.subr.bf16.mxu0 %v486_v55  ;;  %v154_v43 = vld [vmem:[#allocation2 + $0x3c8] sm:$0xff]  ;;  %v156_v44 = vld [vmem:[#allocation2 + $0x3d8] sm:$0xff]  ;;  %v504_v46 = vpack.c.bf16 %v151_v40, %v149_v38  ;;  %v442_v47 = vpack.c.bf16 %v92_v42, %v90_v41  ;;  %v89_v48 = vld [vmem:[#allocation2 + $0x1c0] sm:$0xff] }
  0x3b   :  { %v91_v49 = vld [vmem:[#allocation2 + $0x1d0] sm:$0xff]  ;;  %v153_v50 = vld [vmem:[#allocation2 + $0x3c0] sm:$0xff]  ;;  %v506_v51 = vpack.c.bf16 %v156_v44, %v154_v43  ;;  %v94_v53 = vld [vmem:[#allocation2 + $0x1e8] sm:$0xff] }
  0x3c   :  { %425 = vmatpush1.bf16.msra.mxu1 %v424_v61  ;;  %v155_v52 = vld [vmem:[#allocation2 + $0x3d0] sm:$0xff]  ;;  %v96_v54 = vld [vmem:[#allocation2 + $0x1f8] sm:$0xff]  ;;  %v158_v55 = vld [vmem:[#allocation2 + $0x3e8] sm:$0xff]  ;;  %v444_v57 = vpack.c.bf16 %v91_v49, %v89_v48 }
  0x3d   :  { %489 = vmatpush1.bf16.msra.mxu0 %v488_v62  ;;  %427 = vmatprep.subr.bf16.mxu1 %v426_v63  ;;  %v160_v56 = vld [vmem:[#allocation2 + $0x3f8] sm:$0xff]  ;;  %v508_v58 = vpack.c.bf16 %v155_v52, %v153_v50  ;;  %v446_v59 = vpack.c.bf16 %v96_v54, %v94_v53  ;;  %v93_v60 = vld [vmem:[#allocation2 + $0x1e0] sm:$0xff]  ;;  %v95_v61 = vld [vmem:[#allocation2 + $0x1f0] sm:$0xff] }
  0x3e   :  { %491 = vmatprep.subr.bf16.mxu0 %v490_v3  ;;  %v510_v62 = vpack.c.bf16 %v160_v56, %v158_v55  ;;  %v157_v63 = vld [vmem:[#allocation2 + $0x3e0] sm:$0xff]  ;;  %v159_v0 = vld [vmem:[#allocation2 + $0x3f0] sm:$0xff]  ;;  %v448_v1 = vpack.c.bf16 %v95_v61, %v93_v60  ;;  %v28_v3 = vlaneseq }
  0x3f   :  { %v512_v2 = vpack.c.bf16 %v159_v0, %v157_v63 }
  0x40   :  { %429 = vmatpush1.bf16.msra.mxu1 %v428_v9  ;;  %v29_v4 = vand.u32 127, %v28_v3  ;;  %v577_v9 = vmov 1.0  }
  0x41   :  { %493 = vmatpush1.bf16.msra.mxu0 %v492_v10  ;;  %431 = vmatprep.subr.bf16.mxu1 %v430_v11 }
  0x42   :  { %495 = vmatprep.subr.bf16.mxu0 %v494_v15  ;;  %v30_v5 = vadd.s32 128, %v29_v4  ;;  %v32_v6 = vadd.s32 384, %v29_v4  ;;  %v31_v7 = vadd.s32 256, %v29_v4 }
  0x44   :  { %433 = vmatpush1.bf16.msra.mxu1 %v432_v21 }
  0x45   :  { %497 = vmatpush1.bf16.msra.mxu0 %v496_v22  ;;  %435 = vmatprep.subr.bf16.mxu1 %v434_v23 }
  0x46   :  { %499 = vmatprep.subr.bf16.mxu0 %v498_v27 }
  0x48   :  { %437 = vmatpush1.bf16.msra.mxu1 %v436_v33 }
  0x49   :  { %501 = vmatpush1.bf16.msra.mxu0 %v500_v34  ;;  %439 = vmatprep.subr.bf16.mxu1 %v438_v35 }
  0x4a   :  { %503 = vmatprep.subr.bf16.mxu0 %v502_v39 }
  0x4c   :  { %441 = vmatpush1.bf16.msra.mxu1 %v440_v45 }
  0x4d   :  { %505 = vmatpush1.bf16.msra.mxu0 %v504_v46  ;;  %443 = vmatprep.subr.bf16.mxu1 %v442_v47 }
  0x4e   :  { %507 = vmatprep.subr.bf16.mxu0 %v506_v51 }
  0x50   :  { %445 = vmatpush1.bf16.msra.mxu1 %v444_v57 }
  0x51   :  { %509 = vmatpush1.bf16.msra.mxu0 %v508_v58  ;;  %447 = vmatprep.subr.bf16.mxu1 %v446_v59 }
  0x52   :  { %511 = vmatprep.subr.bf16.mxu0 %v510_v62 }
  0x54   :  { %449 = vmatpush1.bf16.msra.mxu1 %v448_v1 }
  0x55   :  { %513 = vmatpush1.bf16.msra.mxu0 %v512_v2 }
  0x94   :  { %v163_v8 = vpop.permute.xlu0 %162 }
  0x95   :  { %vm168_vm0 = vcmp.eq.s32.totalorder %v163_v8, %v30_v5  ;;  %vm170_vm1 = vcmp.eq.s32.totalorder %v163_v8, %v32_v6  ;;  %vm167_vm2 = vcmp.eq.s32.totalorder %v163_v8, %v29_v4  ;;  %vm169_vm3 = vcmp.eq.s32.totalorder %v163_v8, %v31_v7 }
  0x96   :  { %378 = vmatprep.mubr.msk.f32.mxu1 %vm168_vm0, %v577_v9  ;;  %382 = vmatprep.mubr.msk.f32.mxu0 %vm170_vm1, %v577_v9 }
  0x97   :  { %379 = vmatmul.mubr.msk.f32.vlgmr.msra.gmra.mrb[0].mxu1 %vm167_vm2, %v577_v9  ;;  %383 = vmatmul.mubr.msk.f32.vlgmr.msra.gmra.mrb[0].mxu0 %vm169_vm3, %v577_v9 }
  0x98   :  { %v166_v10 = vpop.permute.xlu0 %165 }
  0x99   :  { %vm172_vm4 = vcmp.eq.s32.totalorder %v166_v10, %v30_v5  ;;  %vm174_vm5 = vcmp.eq.s32.totalorder %v166_v10, %v32_v6  ;;  %vm171_vm6 = vcmp.eq.s32.totalorder %v166_v10, %v29_v4  ;;  %vm173_vm7 = vcmp.eq.s32.totalorder %v166_v10, %v31_v7 }
  0x9a   :  { %380 = vmatprep.mubr.msk.f32.mxu1 %vm172_vm4, %v577_v9  ;;  %384 = vmatprep.mubr.msk.f32.mxu0 %vm174_vm5, %v577_v9 }
  0x9b   :  { %381 = vmatmul.mubr.msk.f32.gmra.mrb[2].mxu1 %vm171_vm6, %v577_v9  ;;  %385 = vmatmul.mubr.msk.f32.gmra.mrb[2].mxu0 %vm173_vm7, %v577_v9 }
 0x16a   :  { %v257_v11 = vpop.f32.mrb[0].mxu1  ;;  %v334_v12 = vpop.f32.mrb[0].mxu0 }
 0x16b   :  { %v335_v13 = vadd.f32 %v334_v12, %v257_v11  ;;  %v259_v14 = vpop.f32.mrb[1].mxu1  ;;  %v336_v15 = vpop.f32.mrb[1].mxu0 }
 0x16c   :  { %v337_v16 = vadd.f32 %v336_v15, %v259_v14 }
 0x16d   :  { %v345_v17 = vmul.f32 16.0, %v335_v13 }
 0x16e   :  { %v346_v18 = vmul.f32 16.0, %v337_v16  ;;  %v263_v19 = vpop.f32.mrb[2].mxu1  ;;  %v340_v20 = vpop.f32.mrb[2].mxu0 }
 0x16f   :  { %349 = vst [vmem:[#allocation5] sm:$0xff] %v345_v17  ;;  %v341_v21 = vadd.f32 %v340_v20, %v263_v19  ;;  %v265_v22 = vpop.f32.mrb[3].mxu1  ;;  %v342_v23 = vpop.f32.mrb[3].mxu0 }
 0x170   :  { %350 = vst [vmem:[#allocation5 + $0x8] sm:$0xff] %v346_v18  ;;  %v343_v24 = vadd.f32 %v342_v23, %v265_v22 }
 0x171   :  { %v347_v25 = vmul.f32 16.0, %v341_v21 }
 0x172   :  { %v348_v26 = vmul.f32 16.0, %v343_v24 }
 0x173   :  { %351 = vst [vmem:[#allocation5 + $0x10] sm:$0xff] %v347_v25 }
 0x174   :  { %352 = vst [vmem:[#allocation5 + $0x18] sm:$0xff] %v348_v26 }
 0x175   :  { %558 = shalt.err (!%p555_p12)
}
 0x176   :  { %s559_s30 = scalar_lea.hbm %s632_s2, 512 }
 0x177   :  { %p560_p13 = scmp.ne.s32.totalorder %s632_s2, %s559_s30  ;;  %p563_p0 = scmp.lt.u32.totalorder %s559_s30, %s632_s2 }
 0x179   :  { %p565_p1 = pnand %p563_p0, %p560_p13 }
 0x17b   :  { %568 = shalt.err (!%p565_p1)
}
 0x17c   :  { %364 = dma.vmem_to_hbm [thread:$0]  %s359_s1, 512, %s632_s2, [#allocation4], %s574_s19, %s574_s19, %s575_s20  }
 0x17d   :  { %571 = dma.done.wait [#allocation4], 512  }
 0x17e   :  { %572 = vsyncadd [#allocation4], 4294966784 }
 0x17f   :  { %368 = vsyncpa [#allocation3], 1 }
 0x180   :  { %369 = vsyncpa [#allocation4], 1 }

</bundles_post_ra>
